<compile_context>
chip_gen: v5e
topology: v5e:2x2
jax: 0.10.0
libtpu: 0.0.40
codegen_flags: <defaults>
</compile_context>

<pallas_src>
import jax
import jax.numpy as jnp
import numpy as np
from jax import lax
from jax.experimental import pallas as pl
from jax.experimental.pallas import tpu as pltpu

_MIN_VMEM_LIMIT = 16 * 1024 * 1024


# ---------------------------------------------------------------------------
# Generation-aware budgets and block-size selection.
# ---------------------------------------------------------------------------
def _chip_budgets():
    """Per-generation block-byte targets + VMEM request ceiling (trace time)."""
    try:
        vmem = int(pltpu.get_tpu_info().vmem_capacity_bytes)
    except Exception:  # non-TPU tracing / older API -> conservative defaults
        vmem = 64 * 1024 * 1024
    if vmem <= 64 * 1024 * 1024:
        # v7x-class (64 MiB / TC): cap well below physical for Mosaic scratch.
        return {"stats": 8 << 20, "norm": 6 << 20, "cap": 48 << 20}
    # v5e / v6e (128 MiB physical): bigger tiles amortize the ~0.35us/step cost.
    return {"stats": 12 << 20, "norm": 10 << 20, "cap": 100 << 20}


def _stats_block_target(cfg, itemsize):
    # VMEM need ~ 2*block (double-buffered input) + ~12*block/itemsize (f32
    # loop carries / slice) -> keep the worst case under ~70% of the cap.
    return max(256 * 1024, min(cfg["stats"],
                               int(0.70 * cfg["cap"] / (2 + 12.0 / itemsize))))


def _norm_block_target(cfg, itemsize):
    # VMEM need ~ 4*block (in+out double-buffered) + block*4/itemsize (f32 temp).
    return max(256 * 1024, min(cfg["norm"],
                               int(0.70 * cfg["cap"] / (4 + 4.0 / itemsize))))


def _largest_divisor_leq(n, cap):
    cap = max(1, min(n, cap))
    best = 1
    i = 1
    while i * i <= n:
        if n % i == 0:
            lo, hi = i, n // i
            if lo <= cap:
                best = max(best, lo)
            if hi <= cap:
                best = max(best, hi)
        i += 1
    return best


def _sublane_pack(dtype):
    return 8 * max(1, 4 // jnp.dtype(dtype).itemsize)   # f32:8, bf16:16, i8:32


def _pick_spatial_block(s, c, itemsize, target):
    """Lane block: a multiple of 128 (only if S % 128 == 0), else full S."""
    if s % 128 != 0 or c * s * itemsize <= target:
        return s
    units = max(1, target // (128 * c * itemsize))
    return 128 * _largest_divisor_leq(s // 128, units)


def _pick_channel_block(c, bs, itemsize, target, pack):
    """Sublane block: multiple of the dtype pack when the full-C frame is too big."""
    if c * bs * itemsize <= target or c % pack != 0:
        return c
    units = max(1, target // (pack * bs * itemsize))
    return pack * _largest_divisor_leq(c // pack, units)


def _pick_batch_block(b, frame_bytes, target, allow_ragged=False):
    cap = max(1, target // max(frame_bytes, 1))
    best = _largest_divisor_leq(b, cap)
    if allow_ragged and best * 2 <= min(b, cap):
        # Awkward B (prime-ish): take a non-divisor block; the tail block is
        # handled by a cdiv grid with masked partial stores (elementwise only).
        return min(b, cap)
    return best


def _vmem_limit(nbytes, cap):
    """`nbytes` already counts every buffer; ~35% slack for compiler temps."""
    return int(min(max(int(nbytes * 1.35), _MIN_VMEM_LIMIT), cap))


def _cb_tile_bytes(bc):
    # Padded VMEM footprint of a (<=2, bc, 1) scale/bias or partial tile.
    return 2 * (-(-bc // 8) * 8) * 128 * 4


def _lane_tile_bytes(rows, lanes):
    return (-(-rows // 8) * 8) * (-(-lanes // 128) * 128) * 4


# ---------------------------------------------------------------------------
# Layout A (S >= 128): C on sublanes, H*W on lanes.
# ---------------------------------------------------------------------------
def _stats_kernel(x_ref, out_ref):
    """Per-channel partial (sum, sumsq), accumulated across the ns grid axis.

    x block:   (bb, bc, bs)   -- channels on sublanes, spatial on lanes
    out block: (1, 2, bc, 1)  -- resident accumulator (index constant in ns)
    """
    @pl.when(pl.program_id(2) == 0)
    def _():
        out_ref[...] = jnp.zeros_like(out_ref)

    bb = x_ref.shape[0]

    def body(i, carry):                               # bounded live set: two
        s, q = carry                                  # (bc, bs) f32 carries
        xi = x_ref[i].astype(jnp.float32)             # + one slice
        return s + xi, q + xi * xi

    zero = jnp.zeros(x_ref.shape[1:], jnp.float32)
    s, q = lax.fori_loop(0, bb, body, (zero, zero), unroll=bb <= 8)
    out_ref[0, 0] += jnp.sum(s, axis=-1, keepdims=True)   # single lane reduce
    out_ref[0, 1] += jnp.sum(q, axis=-1, keepdims=True)


def _channel_sums(x_bcs, bb, bc, bs, cfg):
    """x_bcs: (B, C, S).  Returns per-channel f32 (sum, sumsq) as (C,) arrays."""
    B, C, S = x_bcs.shape
    nb, ncb, ns = B // bb, C // bc, S // bs
    block_bytes = bb * bc * bs * jnp.dtype(x_bcs.dtype).itemsize
    vmem_need = 2 * block_bytes + 3 * bc * bs * 4 + 2 * _cb_tile_bytes(bc)
    partials = pl.pallas_call(
        _stats_kernel,
        out_shape=jax.ShapeDtypeStruct((nb, 2, C, 1), jnp.float32),
        grid=(nb, ncb, ns),
        in_specs=[pl.BlockSpec((bb, bc, bs), lambda i, c, j: (i, c, j))],
        out_specs=pl.BlockSpec((1, 2, bc, 1), lambda i, c, j: (i, 0, c, 0)),
        compiler_params=pltpu.CompilerParams(
            dimension_semantics=("parallel", "parallel", "arbitrary"),
            vmem_limit_bytes=_vmem_limit(vmem_need, cfg["cap"])),
    )(x_bcs)
    totals = jnp.sum(partials[..., 0], axis=0)            # (2, C) -- tiny
    return totals[0], totals[1]


def _norm_kernel(x_ref, sb_ref, o_ref):
    """y = x * scale[t, c] + bias[t, c]  (fused BN affine + TEBN time weight).

    x block: (bn, 1, bc, bs); sb block: (1, 2, bc, 1) (sublane-aligned).
    """
    x = x_ref[...].astype(jnp.float32)
    scale = sb_ref[0, 0]                                   # (bc, 1)
    bias = sb_ref[0, 1]                                    # (bc, 1)
    o_ref[...] = (x * scale + bias).astype(o_ref.dtype)


def _apply_norm(x_ntcs, sb, bn, bc, bs, cfg):
    """x_ntcs: (N, T, C, S); sb: (T, 2, C, 1) fused f32 scale/bias."""
    N, T, C, S = x_ntcs.shape
    nblk, ncb, ns = pl.cdiv(N, bn), C // bc, S // bs
    block_bytes = bn * bc * bs * jnp.dtype(x_ntcs.dtype).itemsize
    vmem_need = 4 * block_bytes + bn * bc * bs * 4 + 2 * _cb_tile_bytes(bc)
    # v7x megacore: lead with the largest independent axis (T is often tiny or
    # odd in SNNs); re-DMAing the tiny sb tile per step costs ~KBs, nothing.
    if nblk >= ns:
        grid = (nblk, ns, ncb, T)
        xmap = lambda i, j, c, t: (i, t, c, j)
        smap = lambda i, j, c, t: (t, 0, c, 0)
    else:
        grid = (ns, nblk, ncb, T)
        xmap = lambda j, i, c, t: (i, t, c, j)
        smap = lambda j, i, c, t: (t, 0, c, 0)
    return pl.pallas_call(
        _norm_kernel,
        out_shape=jax.ShapeDtypeStruct((N, T, C, S), x_ntcs.dtype),
        grid=grid,
        in_specs=[pl.BlockSpec((bn, 1, bc, bs), xmap),
                  pl.BlockSpec((1, 2, bc, 1), smap)],
        out_specs=pl.BlockSpec((bn, 1, bc, bs), xmap),
        compiler_params=pltpu.CompilerParams(
            dimension_semantics=("parallel",) * 4,
            vmem_limit_bytes=_vmem_limit(vmem_need, cfg["cap"])),
    )(x_ntcs, sb)


# ---------------------------------------------------------------------------
# Layout B (S < 128): lane-dense flattened L = C*H*W on the lane axis.
# ---------------------------------------------------------------------------
def _stats_lane_kernel(x_ref, out_ref):
    """Per-(c*s) lane partial sums.  x block: (bb, 1, L); out block: (1, 2, L)."""
    x = x_ref[...].astype(jnp.float32)                     # (bb, 1, L)
    out_ref[0, 0:1, :] = jnp.sum(x, axis=0)                # (1, L)  VALU only
    out_ref[0, 1:2, :] = jnp.sum(x * x, axis=0)


def _channel_sums_lane(x_b1l, C, S, bb, cfg):
    """x_b1l: (B, 1, L) with L = C*S.  Returns per-channel f32 (sum, sumsq)."""
    B, _, L = x_b1l.shape
    nb = B // bb
    block_bytes = bb * L * jnp.dtype(x_b1l.dtype).itemsize
    vmem_need = 2 * block_bytes + 2 * bb * L * 4 + 2 * _lane_tile_bytes(2, L)
    partials = pl.pallas_call(
        _stats_lane_kernel,
        out_shape=jax.ShapeDtypeStruct((nb, 2, L), jnp.float32),
        grid=(nb,),
        in_specs=[pl.BlockSpec((bb, 1, L), lambda i: (i, 0, 0))],
        out_specs=pl.BlockSpec((1, 2, L), lambda i: (i, 0, 0)),
        compiler_params=pltpu.CompilerParams(
            dimension_semantics=("parallel",),
            vmem_limit_bytes=_vmem_limit(vmem_need, cfg["cap"])),
    )(x_b1l)
    per_lane = jnp.sum(partials, axis=0).reshape(2, C, S)  # tiny
    totals = jnp.sum(per_lane, axis=-1)                    # (2, C)
    return totals[0], totals[1]


def _norm_lane_kernel(x_ref, sb_ref, o_ref):
    """Lane-dense normalize: x block (bn, 1, 1, L); sb block (1, 2, L)."""
    x = x_ref[...].astype(jnp.float32)
    scale = sb_ref[0, 0:1, :]                              # (1, L)
    bias = sb_ref[0, 1:2, :]                               # (1, L)
    o_ref[...] = (x * scale + bias).astype(o_ref.dtype)


def _apply_norm_lane(x_nt1l, sb_l, bn, cfg):
    """x_nt1l: (N, T, 1, L); sb_l: (T, 2, L) per-(t, c*s) fused scale/bias."""
    N, T, _, L = x_nt1l.shape
    nblk = pl.cdiv(N, bn)
    block_bytes = bn * L * jnp.dtype(x_nt1l.dtype).itemsize
    vmem_need = 4 * block_bytes + bn * L * 4 + 2 * _lane_tile_bytes(2, L)
    return pl.pallas_call(
        _norm_lane_kernel,
        out_shape=jax.ShapeDtypeStruct((N, T, 1, L), x_nt1l.dtype),
        grid=(nblk, T),
        in_specs=[pl.BlockSpec((bn, 1, 1, L), lambda i, t: (i, t, 0, 0)),
                  pl.BlockSpec((1, 2, L), lambda i, t: (t, 0, 0))],
        out_specs=pl.BlockSpec((bn, 1, 1, L), lambda i, t: (i, t, 0, 0)),
        compiler_params=pltpu.CompilerParams(
            dimension_semantics=("parallel", "parallel"),
            vmem_limit_bytes=_vmem_limit(vmem_need, cfg["cap"])),
    )(x_nt1l, sb_l)


# ---------------------------------------------------------------------------
# Forward
# ---------------------------------------------------------------------------
def sync_tebn_forward(x, te_weight, gamma, beta, eps=1e-5):
    """SyncTEBN forward (initialized, training-mode batch statistics).

    x:         (N, T, C, H, W)
    te_weight: (T,) or (1, T, 1, 1, 1)  -- TEBN per-timestep weight
    gamma:     (C,)   -- SyncBatchNorm weight
    beta:      (C,)   -- SyncBatchNorm bias
    """
    N, T, C, H, W = x.shape
    S = H * W
    B = N * T
    itemsize = jnp.dtype(x.dtype).itemsize
    cfg = _chip_budgets()
    stats_tgt = _stats_block_target(cfg, itemsize)
    norm_tgt = _norm_block_target(cfg, itemsize)
    pack = _sublane_pack(x.dtype)
    lane_dense = S < 128        # small feature maps (7x7, ...): flatten C*H*W

    # ---- Pass 1: per-channel sum / sum-of-squares (free reshape of x). -----
    if lane_dense:
        L = C * S
        bb = _pick_batch_block(B, L * itemsize, stats_tgt)
        s, sq = _channel_sums_lane(x.reshape(B, 1, L), C, S, bb, cfg)
    else:
        bs = _pick_spatial_block(S, C, itemsize, stats_tgt)
        bc = _pick_channel_block(C, bs, itemsize, stats_tgt, pack)
        bb = _pick_batch_block(B, bc * bs * itemsize, stats_tgt)
        s, sq = _channel_sums(x.reshape(B, C, S), bb, bc, bs, cfg)

    # TODO(synk): cross-replica sync of (sum, sumsq, count) via lax.psum under
    # shard_map (the "Sync" in SyncBatchNorm); running-stat momentum update and
    # the eval / lazy-first-call identity paths are likewise not modeled here.
    count = jnp.float32(B * S)
    mean = s / count
    # TODO(synk): E[x^2]-E[x]^2 in f32 can cancel when |mean| >> std; the clamp
    # keeps rsqrt finite, a shifted two-pass variance would cost an extra read.
    var = jnp.maximum(sq / count - mean * mean, 0.0)
    invstd = lax.rsqrt(var + jnp.float32(eps))

    scale_c = gamma.astype(jnp.float32) * invstd                 # (C,)
    shift_c = beta.astype(jnp.float32) - mean * scale_c          # (C,)
    w = te_weight.astype(jnp.float32).reshape(T)                 # (T,)
    scale_tc = w[:, None] * scale_c[None, :]                     # (T, C)
    bias_tc = w[:, None] * shift_c[None, :]                      # (T, C)

    # ---- Pass 2: fused normalize + BN affine + TEBN time scale. ------------
    if lane_dense:
        L = C * S
        sb = jnp.stack([scale_tc, bias_tc], axis=1)[..., None]   # (T, 2, C, 1)
        sb = jnp.broadcast_to(sb, (T, 2, C, S)).reshape(T, 2, L)
        bn_ = _pick_batch_block(N, L * itemsize, norm_tgt, allow_ragged=True)
        y = _apply_norm_lane(x.reshape(N, T, 1, L), sb, bn_, cfg)
    else:
        sb = jnp.stack([scale_tc, bias_tc], axis=1)[..., None]   # (T, 2, C, 1)
        bsn = _pick_spatial_block(S, C, itemsize, norm_tgt)
        bcn = _pick_channel_block(C, bsn, itemsize, norm_tgt, pack)
        bn_ = _pick_batch_block(N, bcn * bsn * itemsize, norm_tgt,
                                allow_ragged=True)
        y = _apply_norm(x.reshape(N, T, C, S), sb, bn_, bcn, bsn, cfg)

    return y.reshape(N, T, C, H, W)


# ---------------------------------------------------------------------------
# Pure-JAX reference mirroring Tosnn(SyncBatchNorm) + TEBN weight.
# ---------------------------------------------------------------------------
def _reference(x, te_weight, gamma, beta, eps=1e-5):
    N, T, C, H, W = x.shape
    xr = x.reshape(N * T, C, H, W).astype(jnp.float32)
    mean = jnp.mean(xr, axis=(0, 2, 3))
    var = jnp.var(xr, axis=(0, 2, 3))
    xhat = (xr - mean[None, :, None, None]) * lax.rsqrt(
        var + eps)[None, :, None, None]
    normx = gamma[None, :, None, None] * xhat + beta[None, :, None, None]
    normx = normx.reshape(N, T, C, H, W)
    return normx * te_weight.reshape(1, T, 1, 1, 1).astype(jnp.float32)


if __name__ == "__main__":
    def _run_case(key, shape):
        N, T, C, H, W = shape
        x = jax.random.normal(key, shape, dtype=jnp.float32) * 2.0 + 0.5
        # Module shapes: TEBN weight (1, T, 1, 1, 1), BN gamma/beta (C,).
        te_weight = (1.0 + 0.05 * jnp.arange(T, dtype=jnp.float32)
                     ).reshape(1, T, 1, 1, 1)
        gamma = 1.0 + 0.01 * jnp.arange(C, dtype=jnp.float32)
        beta = 0.1 * jnp.arange(C, dtype=jnp.float32)
        out = jax.block_until_ready(
            sync_tebn_forward(x, te_weight, gamma, beta, eps=1e-5))
        ref = _reference(x, te_weight, gamma, beta, eps=1e-5)
        np.testing.assert_allclose(np.asarray(out), np.asarray(ref),
                                   rtol=1e-3, atol=1e-3)

    k1, k2 = jax.random.split(jax.random.PRNGKey(0))
    _run_case(k1, (2, 4, 8, 16, 16))   # S >= 128: C-sublane / HW-lane layout
    _run_case(k2, (2, 3, 16, 7, 7))    # S < 128: lane-dense flattened C*H*W
    print("KERNEL_OK")
</pallas_src>

<mosaic_0001>
module attributes {stable_mosaic.version = 11 : i64} {
  func.func @_stats_kernel(%arg0: i32, %arg1: i32, %arg2: i32, %arg3: memref<8x8x256xf32, #tpu.memory_space<vmem>>, %arg4: memref<1x2x8x1xf32, #tpu.memory_space<vmem>>) attributes {dimension_semantics = [#tpu.dimension_semantics<parallel>, #tpu.dimension_semantics<parallel>, #tpu.dimension_semantics<arbitrary>], iteration_bounds = array<i64: 1, 1, 1>, scalar_prefetch = 0 : i64, scratch_operands = 0 : i64, tpu.core_type = #tpu.core_type<tc>, window_params = [{transform_indices = @transform_0, window_bounds = array<i64: 8, 8, 256>}, {transform_indices = @transform_1, window_bounds = array<i64: 1, 2, 8, 1>}]} {
    %c0_i32 = arith.constant 0 : i32
    %0 = arith.cmpi eq, %arg2, %c0_i32 : i32
    %1 = arith.extui %0 : i1 to i32
    %c0_i32_0 = arith.constant 0 : i32
    %2 = arith.cmpi ne, %1, %c0_i32_0 : i32
    scf.if %2 {
      %cst_34 = arith.constant 0.000000e+00 : f32
      %68 = vector.broadcast %cst_34 : f32 to vector<1x2x8x1xf32>
      %c0_35 = arith.constant 0 : index
      %c0_36 = arith.constant 0 : index
      %c0_37 = arith.constant 0 : index
      %c0_38 = arith.constant 0 : index
      %69 = vector.load %arg4[%c0_35, %c0_36, %c0_37, %c0_38] : memref<1x2x8x1xf32, #tpu.memory_space<vmem>>, vector<1x2x8x1xf32>
      tpu.vector_store %arg4[%c0_35, %c0_36, %c0_37, %c0_38], %68 {strides = array<i32>} : memref<1x2x8x1xf32, #tpu.memory_space<vmem>>, vector<1x2x8x1xf32>,
    } else {
    }
    %cst = arith.constant 0.000000e+00 : f32
    %3 = vector.broadcast %cst : f32 to vector<8x256xf32>
    %c0_i32_1 = arith.constant 0 : i32
    %4 = arith.index_cast %c0_i32_1 : i32 to index
    %c0 = arith.constant 0 : index
    %c0_2 = arith.constant 0 : index
    %5 = vector.load %arg3[%4, %c0, %c0_2] : memref<8x8x256xf32, #tpu.memory_space<vmem>>, vector<1x8x256xf32>
    %6 = vector.shape_cast %5 : vector<1x8x256xf32> to vector<8x256xf32>
    %7 = arith.addf %3, %6 : vector<8x256xf32>
    %8 = arith.mulf %6, %6 : vector<8x256xf32>
    %9 = arith.addf %3, %8 : vector<8x256xf32>
    %c1_i32 = arith.constant 1 : i32
    %10 = arith.index_cast %c1_i32 : i32 to index
    %c0_3 = arith.constant 0 : index
    %c0_4 = arith.constant 0 : index
    %11 = vector.load %arg3[%10, %c0_3, %c0_4] : memref<8x8x256xf32, #tpu.memory_space<vmem>>, vector<1x8x256xf32>
    %12 = vector.shape_cast %11 : vector<1x8x256xf32> to vector<8x256xf32>
    %13 = arith.addf %7, %12 : vector<8x256xf32>
    %14 = arith.mulf %12, %12 : vector<8x256xf32>
    %15 = arith.addf %9, %14 : vector<8x256xf32>
    %c2_i32 = arith.constant 2 : i32
    %16 = arith.index_cast %c2_i32 : i32 to index
    %c0_5 = arith.constant 0 : index
    %c0_6 = arith.constant 0 : index
    %17 = vector.load %arg3[%16, %c0_5, %c0_6] : memref<8x8x256xf32, #tpu.memory_space<vmem>>, vector<1x8x256xf32>
    %18 = vector.shape_cast %17 : vector<1x8x256xf32> to vector<8x256xf32>
    %19 = arith.addf %13, %18 : vector<8x256xf32>
    %20 = arith.mulf %18, %18 : vector<8x256xf32>
    %21 = arith.addf %15, %20 : vector<8x256xf32>
    %c3_i32 = arith.constant 3 : i32
    %22 = arith.index_cast %c3_i32 : i32 to index
    %c0_7 = arith.constant 0 : index
    %c0_8 = arith.constant 0 : index
    %23 = vector.load %arg3[%22, %c0_7, %c0_8] : memref<8x8x256xf32, #tpu.memory_space<vmem>>, vector<1x8x256xf32>
    %24 = vector.shape_cast %23 : vector<1x8x256xf32> to vector<8x256xf32>
    %25 = arith.addf %19, %24 : vector<8x256xf32>
    %26 = arith.mulf %24, %24 : vector<8x256xf32>
    %27 = arith.addf %21, %26 : vector<8x256xf32>
    %c4_i32 = arith.constant 4 : i32
    %28 = arith.index_cast %c4_i32 : i32 to index
    %c0_9 = arith.constant 0 : index
    %c0_10 = arith.constant 0 : index
    %29 = vector.load %arg3[%28, %c0_9, %c0_10] : memref<8x8x256xf32, #tpu.memory_space<vmem>>, vector<1x8x256xf32>
    %30 = vector.shape_cast %29 : vector<1x8x256xf32> to vector<8x256xf32>
    %31 = arith.addf %25, %30 : vector<8x256xf32>
    %32 = arith.mulf %30, %30 : vector<8x256xf32>
    %33 = arith.addf %27, %32 : vector<8x256xf32>
    %c5_i32 = arith.constant 5 : i32
    %34 = arith.index_cast %c5_i32 : i32 to index
    %c0_11 = arith.constant 0 : index
    %c0_12 = arith.constant 0 : index
    %35 = vector.load %arg3[%34, %c0_11, %c0_12] : memref<8x8x256xf32, #tpu.memory_space<vmem>>, vector<1x8x256xf32>
    %36 = vector.shape_cast %35 : vector<1x8x256xf32> to vector<8x256xf32>
    %37 = arith.addf %31, %36 : vector<8x256xf32>
    %38 = arith.mulf %36, %36 : vector<8x256xf32>
    %39 = arith.addf %33, %38 : vector<8x256xf32>
    %c6_i32 = arith.constant 6 : i32
    %40 = arith.index_cast %c6_i32 : i32 to index
    %c0_13 = arith.constant 0 : index
    %c0_14 = arith.constant 0 : index
    %41 = vector.load %arg3[%40, %c0_13, %c0_14] : memref<8x8x256xf32, #tpu.memory_space<vmem>>, vector<1x8x256xf32>
    %42 = vector.shape_cast %41 : vector<1x8x256xf32> to vector<8x256xf32>
    %43 = arith.addf %37, %42 : vector<8x256xf32>
    %44 = arith.mulf %42, %42 : vector<8x256xf32>
    %45 = arith.addf %39, %44 : vector<8x256xf32>
    %c7_i32 = arith.constant 7 : i32
    %46 = arith.index_cast %c7_i32 : i32 to index
    %c0_15 = arith.constant 0 : index
    %c0_16 = arith.constant 0 : index
    %47 = vector.load %arg3[%46, %c0_15, %c0_16] : memref<8x8x256xf32, #tpu.memory_space<vmem>>, vector<1x8x256xf32>
    %48 = vector.shape_cast %47 : vector<1x8x256xf32> to vector<8x256xf32>
    %49 = arith.addf %43, %48 : vector<8x256xf32>
    %50 = arith.mulf %48, %48 : vector<8x256xf32>
    %51 = arith.addf %45, %50 : vector<8x256xf32>
    %c8_i32 = arith.constant 8 : i32
    %c0_17 = arith.constant 0 : index
    %c0_18 = arith.constant 0 : index
    %c0_19 = arith.constant 0 : index
    %c0_20 = arith.constant 0 : index
    %52 = vector.load %arg4[%c0_17, %c0_18, %c0_19, %c0_20] : memref<1x2x8x1xf32, #tpu.memory_space<vmem>>, vector<1x1x8x1xf32>
    %53 = vector.shape_cast %52 : vector<1x1x8x1xf32> to vector<8x1xf32>
    %cst_21 = arith.constant dense<0.000000e+00> : vector<8xf32>
    %54 = vector.multi_reduction <add>, %49, %cst_21 [1] : vector<8x256xf32> to vector<8xf32>
    %55 = vector.shape_cast %54 : vector<8xf32> to vector<8x1xf32>
    %56 = arith.addf %53, %55 : vector<8x1xf32>
    %c0_22 = arith.constant 0 : index
    %c0_23 = arith.constant 0 : index
    %c0_24 = arith.constant 0 : index
    %c0_25 = arith.constant 0 : index
    %57 = vector.load %arg4[%c0_22, %c0_23, %c0_24, %c0_25] : memref<1x2x8x1xf32, #tpu.memory_space<vmem>>, vector<1x1x8x1xf32>
    %58 = vector.shape_cast %57 : vector<1x1x8x1xf32> to vector<8x1xf32>
    %59 = vector.shape_cast %56 : vector<8x1xf32> to vector<1x1x8x1xf32>
    tpu.vector_store %arg4[%c0_22, %c0_23, %c0_24, %c0_25], %59 {strides = array<i32>} : memref<1x2x8x1xf32, #tpu.memory_space<vmem>>, vector<1x1x8x1xf32>,
    %c0_26 = arith.constant 0 : index
    %c1 = arith.constant 1 : index
    %c0_27 = arith.constant 0 : index
    %c0_28 = arith.constant 0 : index
    %60 = vector.load %arg4[%c0_26, %c1, %c0_27, %c0_28] : memref<1x2x8x1xf32, #tpu.memory_space<vmem>>, vector<1x1x8x1xf32>
    %61 = vector.shape_cast %60 : vector<1x1x8x1xf32> to vector<8x1xf32>
    %cst_29 = arith.constant dense<0.000000e+00> : vector<8xf32>
    %62 = vector.multi_reduction <add>, %51, %cst_29 [1] : vector<8x256xf32> to vector<8xf32>
    %63 = vector.shape_cast %62 : vector<8xf32> to vector<8x1xf32>
    %64 = arith.addf %61, %63 : vector<8x1xf32>
    %c0_30 = arith.constant 0 : index
    %c1_31 = arith.constant 1 : index
    %c0_32 = arith.constant 0 : index
    %c0_33 = arith.constant 0 : index
    %65 = vector.load %arg4[%c0_30, %c1_31, %c0_32, %c0_33] : memref<1x2x8x1xf32, #tpu.memory_space<vmem>>, vector<1x1x8x1xf32>
    %66 = vector.shape_cast %65 : vector<1x1x8x1xf32> to vector<8x1xf32>
    %67 = vector.shape_cast %64 : vector<8x1xf32> to vector<1x1x8x1xf32>
    tpu.vector_store %arg4[%c0_30, %c1_31, %c0_32, %c0_33], %67 {strides = array<i32>} : memref<1x2x8x1xf32, #tpu.memory_space<vmem>>, vector<1x1x8x1xf32>,
    return
  }
  func.func @transform_0(%arg0: i32, %arg1: i32, %arg2: i32) -> (i32, i32, i32) {
    %c0_i32 = arith.constant 0 : i32
    return %arg0, %arg1, %arg2 : i32, i32, i32
  }
  func.func @transform_1(%arg0: i32, %arg1: i32, %arg2: i32) -> (i32, i32, i32, i32) {
    %c0_i32 = arith.constant 0 : i32
    %c0_i32_0 = arith.constant 0 : i32
    %c0_i32_1 = arith.constant 0 : i32
    return %arg0, %c0_i32, %arg1, %c0_i32_0 : i32, i32, i32, i32
  }
}

</mosaic_0001>

<bundles_post_ra>
// kernel: tpu_custom_call.1
= control target key start
LH: loop header
LB: loop body
LE: loop exit
PB: predicated region body
PF: predicated region fallthrough
CT: control target
= control target key end

     0   :  { %6 = vsyncpa [#allocation3], 0  ;;  %s153_s9 = smov [#allocation2]   ;;  %s154_s11 = smov 256   ;;  %s192_s0 = inlined_call_operand.hbm [shape: f32[8,8,256], index: 0, kind: input, shape index: {}]   ;;  %s193_s1 = inlined_call_operand.vmem [shape: f32[1,2,8,1], index: 1, kind: output, shape index: {}]  }
   0x1   :  { %s11_s8 = sshll.u32 %s192_s0, 4  ;;  %s13_s10 = sshll.u32 %s153_s9, 4  ;;  %s12_s8 = int_to_ptr.hbm [resolvable:$true] %s11_s8  ;;  %s14_s10 = int_to_ptr.vmem [resolvable:$true] %s13_s10 }
   0x2   :  { %s155_s12 = smov 16  }
   0x3   :  { %19 = dma.hbm_to_vmem [thread:$0]  %s12_s8, 2048, %s14_s10, [#allocation3], %s154_s11, %s154_s11, %s155_s12  }
   0x4   :  { %151 = dma.done.wait [#allocation3], 2048  }
   0x5   :  { %152 = vsyncadd [#allocation3], 4294965248  ;;  %vm28_vm0 = vcmask 7168   ;;  %v156_v0 = vmov 0.0   ;;  %v31_v1 = vld [vmem:[#allocation2] sm:$0xff]  ;;  %v32_v2 = vld [vmem:[#allocation2 + $0x8] sm:$0xff] }
   0x6   :  { %29 = vst.msk [vmem:[%s193_s1] sm:$0xff] %vm28_vm0, %v156_v0  ;;  %v40_v3 = vld [vmem:[#allocation2 + $0x10] sm:$0xff]  ;;  %v36_v4 = vmul.f32 %v32_v2, %v32_v2  ;;  %v41_v5 = vld [vmem:[#allocation2 + $0x18] sm:$0xff]  ;;  %v49_v7 = vld [vmem:[#allocation2 + $0x20] sm:$0xff]  ;;  %v35_v13 = vmul.f32 %v31_v1, %v31_v1 }
   0x7   :  { %30 = vst.msk [vmem:[%s193_s1 + $0x8] sm:$0xff] %vm28_vm0, %v156_v0  ;;  %v42_v6 = vadd.f32 %v40_v3, %v31_v1  ;;  %v50_v8 = vld [vmem:[#allocation2 + $0x28] sm:$0xff]  ;;  %v43_v9 = vadd.f32 %v41_v5, %v32_v2  ;;  %v44_v10 = vmul.f32 %v40_v3, %v40_v3  ;;  %v45_v11 = vmul.f32 %v41_v5, %v41_v5  ;;  %v58_v12 = vld [vmem:[#allocation2 + $0x30] sm:$0xff]  ;;  %v59_v15 = vld [vmem:[#allocation2 + $0x38] sm:$0xff] }
   0x8   :  { %v53_v17 = vmul.f32 %v49_v7, %v49_v7  ;;  %v54_v18 = vmul.f32 %v50_v8, %v50_v8  ;;  %v67_v19 = vld [vmem:[#allocation2 + $0x40] sm:$0xff]  ;;  %v62_v21 = vmul.f32 %v58_v12, %v58_v12  ;;  %v68_v22 = vld [vmem:[#allocation2 + $0x48] sm:$0xff]  ;;  %v63_v24 = vmul.f32 %v59_v15, %v59_v15  ;;  %v76_v25 = vld [vmem:[#allocation2 + $0x50] sm:$0xff] }
   0x9   :  { %v51_v14 = vadd.f32 %v49_v7, %v42_v6  ;;  %v52_v16 = vadd.f32 %v50_v8, %v43_v9  ;;  %v46_v26 = vadd.f32 %v44_v10, %v35_v13  ;;  %v47_v27 = vadd.f32 %v45_v11, %v36_v4  ;;  %v77_v30 = vld [vmem:[#allocation2 + $0x58] sm:$0xff]  ;;  %v85_v33 = vld [vmem:[#allocation2 + $0x60] sm:$0xff]  ;;  %v86_v38 = vld [vmem:[#allocation2 + $0x68] sm:$0xff] }
   0xa   :  { %v71_v29 = vmul.f32 %v67_v19, %v67_v19  ;;  %v72_v32 = vmul.f32 %v68_v22, %v68_v22  ;;  %v80_v37 = vmul.f32 %v76_v25, %v76_v25  ;;  %v81_v40 = vmul.f32 %v77_v30, %v77_v30  ;;  %v94_v41 = vld [vmem:[#allocation2 + $0x70] sm:$0xff]  ;;  %v95_v46 = vld [vmem:[#allocation2 + $0x78] sm:$0xff] }
   0xb   :  { %v60_v20 = vadd.f32 %v58_v12, %v51_v14  ;;  %v61_v23 = vadd.f32 %v59_v15, %v52_v16  ;;  %v55_v34 = vadd.f32 %v53_v17, %v46_v26  ;;  %v56_v35 = vadd.f32 %v54_v18, %v47_v27 }
   0xc   :  { %v89_v45 = vmul.f32 %v85_v33, %v85_v33  ;;  %v90_v48 = vmul.f32 %v86_v38, %v86_v38  ;;  %v98_v52 = vmul.f32 %v94_v41, %v94_v41  ;;  %v99_v54 = vmul.f32 %v95_v46, %v95_v46 }
   0xd   :  { %v69_v28 = vadd.f32 %v67_v19, %v60_v20  ;;  %v70_v31 = vadd.f32 %v68_v22, %v61_v23  ;;  %v64_v42 = vadd.f32 %v62_v21, %v55_v34  ;;  %v65_v43 = vadd.f32 %v63_v24, %v56_v35  ;;  %v102_v63 = vld [vmem:[%s193_s1] sm:$0xff] }
   0xe   :  { %v121_v2 = vld [vmem:[%s193_s1 + $0x8] sm:$0xff] }
   0xf   :  { %v78_v36 = vadd.f32 %v76_v25, %v69_v28  ;;  %v79_v39 = vadd.f32 %v77_v30, %v70_v31  ;;  %v73_v49 = vadd.f32 %v71_v29, %v64_v42  ;;  %v74_v50 = vadd.f32 %v72_v32, %v65_v43 }
  0x11   :  { %v87_v44 = vadd.f32 %v85_v33, %v78_v36  ;;  %v88_v47 = vadd.f32 %v86_v38, %v79_v39  ;;  %v82_v55 = vadd.f32 %v80_v37, %v73_v49  ;;  %v83_v56 = vadd.f32 %v81_v40, %v74_v50 }
  0x13   :  { %v96_v51 = vadd.f32 %v94_v41, %v87_v44  ;;  %v97_v53 = vadd.f32 %v95_v46, %v88_v47  ;;  %v91_v58 = vadd.f32 %v89_v45, %v82_v55  ;;  %v92_v59 = vadd.f32 %v90_v48, %v83_v56 }
  0x15   :  { %v103_v57 = vadd.f32 %v97_v53, %v96_v51  ;;  %v100_v60 = vadd.f32 %v98_v52, %v91_v58  ;;  %v101_v61 = vadd.f32 %v99_v54, %v92_v59 }
  0x17   :  { %104 = vadd.xlane.f32.xlu0 %v103_v57  ;;  %v111_v62 = vadd.f32 %v101_v61, %v100_v60 }
  0x1f   :  { %112 = vadd.xlane.f32.xlu0 %v111_v62 }
  0x8a   :  { %v105_v0 = vpop.xlane.xlu0 %104 }
  0x8b   :  { %v106_v1 = vadd.f32 %v105_v0, %v102_v63 }
  0x8d   :  { %108 = vst.msk [vmem:[%s193_s1] sm:$0xff] %vm28_vm0, %v106_v1 }
  0x92   :  { %v113_v3 = vpop.xlane.xlu0 %112 }
  0x93   :  { %v114_v4 = vadd.f32 %v121_v2, %v113_v3 }
  0x95   :  { %122 = vst.msk [vmem:[%s193_s1 + $0x8] sm:$0xff] %vm28_vm0, %v114_v4 }
  0x96   :  { %120 = vsyncpa [#allocation3], 1 }

</bundles_post_ra>
